<compile_context>
chip_gen: v6e
topology: v6e:2x2x1
jax: 0.10.0
libtpu: 0.0.40
codegen_flags: <defaults>
</compile_context>

<pallas_src>
import jax
import jax.numpy as jnp
from jax import lax
from jax.experimental import pallas as pl
from jax.experimental.pallas import tpu as pltpu


def _round_up(n, m):
    return ((n + m - 1) // m) * m


def _device_kind():
    try:
        return jax.devices()[0].device_kind.lower()
    except Exception:
        return ""


def _vmem_estimate(tl, tk, dp):
    """Rough per-step VMEM footprint (bytes) for tile sizes (tl, tk, dp)."""
    bf16, f32, dbl = 2, 4, 2
    x_io = dbl * tl * dp * bf16          # x tile (bf16, double-buffered)
    e_io = dbl * tk * dp * bf16          # codebook tile (bf16)
    esq_io = dbl * tk * f32              # hoisted 0.5*||e||^2 row
    idx_io = dbl * tl * f32              # index output tile
    scratch = 2 * tl * 128 * f32         # (TL,1) accumulators, lane-padded
    interm = 4 * tl * tk * f32           # xe / d / iota / select temporaries
    return x_io + e_io + esq_io + idx_io + scratch + interm


def _choose_tiles(L, Kp, Dp, tl_max, tk_max, budget):
    """Pick (TL, TK): prioritize large TL, shrink TK before TL."""
    TL = min(_round_up(max(L, 16), 16), tl_max)
    # Candidate TKs: multiples of 128 that divide Kp (128 always qualifies).
    start = min(Kp, _round_up(max(tk_max, 128), 128))
    tk_cands = [t for t in range(start, 127, -128) if Kp % t == 0] or [128]
    ti = 0
    TK = tk_cands[ti]
    while _vmem_estimate(TL, TK, Dp) > budget:
        if ti + 1 < len(tk_cands):
            ti += 1
            TK = tk_cands[ti]
        elif TL > 16:
            TL = max(16, (TL // 2 // 16) * 16)
        else:
            break
    return TL, TK


def _prepare_codebook(embeddings):
    """Pad codebook, cast to bf16 and precompute 0.5*||e||^2 (hoisted)."""
    K, D = embeddings.shape
    Dp = _round_up(max(D, 128), 128)
    Kp = _round_up(max(K, 128), 128)
    e_p = jnp.zeros((Kp, Dp), jnp.float32).at[:K, :D].set(
        embeddings.astype(jnp.float32))
    e_bf16 = e_p.astype(jnp.bfloat16)
    # Compute ||e||^2 from the bf16 codebook for tie consistency with the
    # bf16 distance matmul; padded rows get a huge value so they never win.
    half_esq = 0.5 * jnp.sum(e_bf16.astype(jnp.float32) ** 2, axis=-1)
    half_esq = jnp.where(jnp.arange(Kp) < K, half_esq,
                         jnp.float32(1e30))[None, :]          # (1, Kp) f32
    return e_bf16, half_esq


def _vq_kernel(x_ref, emb_ref, hesq_ref, idx_ref, mind_sc, bidx_sc):
    """One (L-tile, K-tile) grid step of the streaming-argmin VQ."""
    k = pl.program_id(1)
    nk = pl.num_programs(1)
    tl = x_ref.shape[0]
    tk = emb_ref.shape[0]

    @pl.when(k == 0)
    def _init():
        mind_sc[...] = jnp.full_like(mind_sc, jnp.inf)
        bidx_sc[...] = jnp.zeros_like(bidx_sc)

    # Squared-distance surrogate on the MXU: bf16 inputs, f32 accumulation.
    # d = 0.5*||e||^2 - x.e  (||x||^2 and the factor 2 are argmin-invariant).
    xe = lax.dot_general(
        x_ref[...], emb_ref[...],
        dimension_numbers=(((1,), (1,)), ((), ())),
        preferred_element_type=jnp.float32)                    # (tl, tk)
    d = hesq_ref[...] - xe                                     # (tl, tk)

    # Per-tile argmin with first-index tie break (global codebook indices).
    iota = lax.broadcasted_iota(jnp.int32, (tl, tk), 1) + k * tk
    tile_min = jnp.min(d, axis=-1, keepdims=True)              # (tl, 1)
    sentinel = jnp.int32(2 ** 30)
    tile_idx = jnp.min(jnp.where(d == tile_min, iota, sentinel),
                       axis=-1, keepdims=True)                 # (tl, 1)

    # Streaming update of the running best across K tiles.
    better = tile_min < mind_sc[...]
    mind_sc[...] = jnp.where(better, tile_min, mind_sc[...])
    bidx_sc[...] = jnp.where(better, tile_idx, bidx_sc[...])

    @pl.when(k == nk - 1)
    def _finalize():
        # TODO(synk): (TL, 1) index store is a masked partial vst; a
        # lane-dense (1, TL) slab would need a sublane->lane relayout and is
        # negligible at these output sizes.
        idx_ref[...] = bidx_sc[...]


def vq_argmin_pallas(x_rows, emb_bf16, half_esq, *, tl_max=512, tk_max=2048):
    """Nearest-codebook indices.  x_rows: (L, D); emb_bf16: (Kp, Dp) padded."""
    L, D = x_rows.shape
    Kp, Dp = emb_bf16.shape

    kind = _device_kind()
    is_v7x = "v7" in kind
    # v7x: only 64 MiB VMEM per TensorCore -> conservative per-core budget.
    # v5e / v6e: 128 MiB physical -> allow much larger resident tiles.
    budget = (22 if is_v7x else 48) * 1024 * 1024
    vmem_cap = (48 if is_v7x else 100) * 1024 * 1024

    TL, TK = _choose_tiles(L, Kp, Dp, tl_max, tk_max, budget)

    # On v7x make sure the "parallel" L axis spans both TensorCores.
    if is_v7x:
        while _round_up(L, TL) // TL < 2 and TL >= 32:
            TL = max(16, (TL // 2 // 16) * 16)

    Lp = _round_up(L, TL)
    nL, nK = Lp // TL, Kp // TK

    # Zero-pad x and stream it in bf16 (padded rows are sliced off afterwards).
    x_p = jnp.zeros((Lp, Dp), jnp.bfloat16).at[:L, :D].set(
        x_rows.astype(jnp.bfloat16))

    est = _vmem_estimate(TL, TK, Dp)
    vmem_limit = int(min(vmem_cap, max(32 * 1024 * 1024, 2 * est)))

    cost = pl.CostEstimate(
        flops=2 * Lp * Kp * Dp,
        transcendentals=0,
        bytes_accessed=int(Lp * Dp * 2                      # x read (bf16)
                           + (nL if nK > 1 else 1) * Kp * Dp * 2  # codebook
                           + Kp * 4 + Lp * 4))              # ||e||^2 + idx

    idx_p = pl.pallas_call(
        _vq_kernel,
        out_shape=jax.ShapeDtypeStruct((Lp, 1), jnp.int32),
        grid=(nL, nK),
        in_specs=[
            pl.BlockSpec((TL, Dp), lambda i, k: (i, 0)),   # x tile (resident across k)
            pl.BlockSpec((TK, Dp), lambda i, k: (k, 0)),   # codebook tile (resident if nK==1)
            pl.BlockSpec((1, TK), lambda i, k: (0, k)),    # hoisted 0.5*||e||^2
        ],
        out_specs=pl.BlockSpec((TL, 1), lambda i, k: (i, 0)),
        scratch_shapes=[
            pltpu.VMEM((TL, 1), jnp.float32),   # running min distance
            pltpu.VMEM((TL, 1), jnp.int32),     # running best index
        ],
        compiler_params=pltpu.CompilerParams(
            dimension_semantics=("parallel", "arbitrary"),
            vmem_limit_bytes=vmem_limit),
        cost_estimate=cost,
    )(x_p, emb_bf16, half_esq)

    return idx_p[:L, 0]


class VectorQuantizedLatent:
    """JAX/Pallas port of the PyTorch module's forward pass."""

    def __init__(self, num_latents, num_embeddings, embedding_size, key):
        self.is_continuous = False
        self.num_latents = num_latents
        self.num_inputs = num_latents * embedding_size
        self.num_embeddings = num_embeddings
        self.embedding_size = embedding_size
        s = 1.0 / embedding_size
        limit = float(jnp.sqrt(3.0 * s))
        # uniform init in [-limit, limit), mirroring torch.rand(...)*2*limit - limit
        self.embeddings = jax.random.uniform(
            key, (num_embeddings, embedding_size),
            minval=-limit, maxval=limit, dtype=jnp.float32)
        # Static per-call codebook prep hoisted out of forward().
        self._emb_bf16, self._half_esq = _prepare_codebook(self.embeddings)

    def forward(self, x):
        x_ = x.reshape(self.num_latents, self.embedding_size)
        indices = vq_argmin_pallas(x_, self._emb_bf16, self._half_esq)
        # Exact f32 row gather from the original table (moved out of the kernel).
        quantized = jnp.take(self.embeddings, indices, axis=0).reshape(-1)
        # Matches torch's x + quantized - x.detach(); forward value == quantized.
        # TODO(synk): under autodiff the Pallas argmin is non-differentiable; wrap
        # it in jax.custom_vjp (indices treated as constant) to reproduce torch's
        # backward (straight-through to x, gather-grad to the embedding table).
        quantized_sg = x + quantized - lax.stop_gradient(x)
        return {
            'z_continuous': x,
            'z_quantized': quantized,
            'z_hat': quantized_sg,
            'z_indices': indices,
        }


if __name__ == "__main__":
    num_latents = 8
    num_embeddings = 64
    embedding_size = 32

    key = jax.random.PRNGKey(0)
    k_emb, k_x = jax.random.split(key)

    module = VectorQuantizedLatent(num_latents, num_embeddings,
                                   embedding_size, k_emb)
    x = jax.random.normal(k_x, (num_latents * embedding_size,), jnp.float32)

    outs = module.forward(x)
    jax.block_until_ready(outs)

    # Sanity checks against a pure-JAX f32 reference.
    x_rows = x.reshape(num_latents, embedding_size)
    emb = module.embeddings
    d_true = jnp.sum((x_rows[:, None, :] - emb[None, :, :]) ** 2, axis=-1)   # (L, K)
    d_min = jnp.min(d_true, axis=-1)

    idx_k = outs['z_indices']
    assert idx_k.shape == (num_latents,)
    assert bool(jnp.all((idx_k >= 0) & (idx_k < num_embeddings)))

    d_chosen = jnp.take_along_axis(d_true, idx_k[:, None].astype(jnp.int32), axis=1)[:, 0]
    # The bf16 distance matmul may flip exact near-ties vs. the f32 reference,
    # but the chosen code must still be (near-)optimal.
    assert bool(jnp.all(d_chosen <= d_min + 2e-1))

    q_rows = outs['z_quantized'].reshape(num_latents, embedding_size)
    assert bool(jnp.allclose(q_rows, emb[idx_k], atol=1e-6))   # exact f32 gather
    assert bool(jnp.allclose(outs['z_hat'], outs['z_quantized'], atol=1e-5))
    assert bool(jnp.array_equal(outs['z_continuous'], x))

    print("KERNEL_OK")
</pallas_src>

<mosaic_0001>
module attributes {stable_mosaic.version = 11 : i64} {
  func.func @_vq_kernel(%arg0: i32, %arg1: i32, %arg2: memref<16x128xbf16, #tpu.memory_space<vmem>>, %arg3: memref<128x128xbf16, #tpu.memory_space<vmem>>, %arg4: memref<1x128xf32, #tpu.memory_space<vmem>>, %arg5: memref<16x1xi32, #tpu.memory_space<vmem>>, %arg6: memref<16x1xf32, #tpu.memory_space<vmem>>, %arg7: memref<16x1xi32, #tpu.memory_space<vmem>>) attributes {dimension_semantics = [#tpu.dimension_semantics<parallel>, #tpu.dimension_semantics<arbitrary>], iteration_bounds = array<i64: 1, 1>, scalar_prefetch = 0 : i64, scratch_operands = 2 : i64, tpu.core_type = #tpu.core_type<tc>, window_params = [{transform_indices = @transform_0, window_bounds = array<i64: 16, 128>}, {transform_indices = @transform_1, window_bounds = array<i64: 128, 128>}, {transform_indices = @transform_2, window_bounds = array<i64: 1, 128>}, {transform_indices = @transform_3, window_bounds = array<i64: 16, 1>}]} {
    %c0_i32 = arith.constant 0 : i32
    %0 = arith.cmpi eq, %arg1, %c0_i32 : i32
    %1 = arith.extui %0 : i1 to i32
    %c0_i32_0 = arith.constant 0 : i32
    %2 = arith.cmpi ne, %1, %c0_i32_0 : i32
    scf.if %2 {
      %cst_20 = arith.constant 0x7F800000 : f32
      %32 = vector.broadcast %cst_20 : f32 to vector<16x1xf32>
      %c0_21 = arith.constant 0 : index
      %c0_22 = arith.constant 0 : index
      %33 = vector.load %arg6[%c0_21, %c0_22] : memref<16x1xf32, #tpu.memory_space<vmem>>, vector<16x1xf32>
      tpu.vector_store %arg6[%c0_21, %c0_22], %32 {strides = array<i32>} : memref<16x1xf32, #tpu.memory_space<vmem>>, vector<16x1xf32>,
      %c0_i32_23 = arith.constant 0 : i32
      %34 = vector.broadcast %c0_i32_23 : i32 to vector<16x1xi32>
      %c0_24 = arith.constant 0 : index
      %c0_25 = arith.constant 0 : index
      %35 = vector.load %arg7[%c0_24, %c0_25] : memref<16x1xi32, #tpu.memory_space<vmem>>, vector<16x1xi32>
      tpu.vector_store %arg7[%c0_24, %c0_25], %34 {strides = array<i32>} : memref<16x1xi32, #tpu.memory_space<vmem>>, vector<16x1xi32>,
    } else {
    }
    %c0 = arith.constant 0 : index
    %c0_1 = arith.constant 0 : index
    %3 = vector.load %arg2[%c0, %c0_1] : memref<16x128xbf16, #tpu.memory_space<vmem>>, vector<16x128xbf16>
    %c0_2 = arith.constant 0 : index
    %c0_3 = arith.constant 0 : index
    %4 = vector.load %arg3[%c0_2, %c0_3] : memref<128x128xbf16, #tpu.memory_space<vmem>>, vector<128x128xbf16>
    %cst = arith.constant dense<0.000000e+00> : vector<16x128xf32>
    %5 = tpu.matmul %3, %4, %cst {dimension_numbers = #tpu.dot_dimension_numbers<[1], [1], [0], [0], [0, 0, 1, 0], [], []>} : vector<16x128xbf16>, vector<128x128xbf16>, vector<16x128xf32> -> vector<16x128xf32>
    %c0_4 = arith.constant 0 : index
    %c0_5 = arith.constant 0 : index
    %6 = vector.load %arg4[%c0_4, %c0_5] : memref<1x128xf32, #tpu.memory_space<vmem>>, vector<1x128xf32>
    %7 = vector.broadcast %6 : vector<1x128xf32> to vector<16x128xf32>
    %8 = arith.subf %7, %5 : vector<16x128xf32>
    %9 = tpu.iota {dimensions = array<i32: 1>} : vector<16x128xi32>
    %c128_i32 = arith.constant 128 : i32
    %10 = arith.muli %arg1, %c128_i32 : i32
    %11 = vector.broadcast %10 : i32 to vector<16x128xi32>
    %12 = arith.addi %9, %11 : vector<16x128xi32>
    %cst_6 = arith.constant dense<0x7F800000> : vector<16xf32>
    %13 = vector.multi_reduction <minimumf>, %8, %cst_6 [1] : vector<16x128xf32> to vector<16xf32>
    %14 = vector.shape_cast %13 : vector<16xf32> to vector<16x1xf32>
    %15 = vector.broadcast %14 : vector<16x1xf32> to vector<16x128xf32>
    %16 = arith.cmpf oeq, %8, %15 : vector<16x128xf32>
    %c1073741824_i32 = arith.constant 1073741824 : i32
    %17 = vector.broadcast %c1073741824_i32 : i32 to vector<16x128xi32>
    %18 = arith.select %16, %12, %17 : vector<16x128xi1>, vector<16x128xi32>
    %cst_7 = arith.constant dense<2147483647> : vector<16xi32>
    %19 = vector.multi_reduction <minsi>, %18, %cst_7 [1] : vector<16x128xi32> to vector<16xi32>
    %20 = vector.shape_cast %19 : vector<16xi32> to vector<16x1xi32>
    %c0_8 = arith.constant 0 : index
    %c0_9 = arith.constant 0 : index
    %21 = vector.load %arg6[%c0_8, %c0_9] : memref<16x1xf32, #tpu.memory_space<vmem>>, vector<16x1xf32>
    %22 = arith.cmpf olt, %14, %21 : vector<16x1xf32>
    %c0_10 = arith.constant 0 : index
    %c0_11 = arith.constant 0 : index
    %23 = vector.load %arg6[%c0_10, %c0_11] : memref<16x1xf32, #tpu.memory_space<vmem>>, vector<16x1xf32>
    %24 = arith.select %22, %14, %23 : vector<16x1xi1>, vector<16x1xf32>
    %c0_12 = arith.constant 0 : index
    %c0_13 = arith.constant 0 : index
    %25 = vector.load %arg6[%c0_12, %c0_13] : memref<16x1xf32, #tpu.memory_space<vmem>>, vector<16x1xf32>
    tpu.vector_store %arg6[%c0_12, %c0_13], %24 {strides = array<i32>} : memref<16x1xf32, #tpu.memory_space<vmem>>, vector<16x1xf32>,
    %c0_14 = arith.constant 0 : index
    %c0_15 = arith.constant 0 : index
    %26 = vector.load %arg7[%c0_14, %c0_15] : memref<16x1xi32, #tpu.memory_space<vmem>>, vector<16x1xi32>
    %27 = arith.select %22, %20, %26 : vector<16x1xi1>, vector<16x1xi32>
    %c0_16 = arith.constant 0 : index
    %c0_17 = arith.constant 0 : index
    %28 = vector.load %arg7[%c0_16, %c0_17] : memref<16x1xi32, #tpu.memory_space<vmem>>, vector<16x1xi32>
    tpu.vector_store %arg7[%c0_16, %c0_17], %27 {strides = array<i32>} : memref<16x1xi32, #tpu.memory_space<vmem>>, vector<16x1xi32>,
    %c0_i32_18 = arith.constant 0 : i32
    %29 = arith.cmpi eq, %arg1, %c0_i32_18 : i32
    %30 = arith.extui %29 : i1 to i32
    %c0_i32_19 = arith.constant 0 : i32
    %31 = arith.cmpi ne, %30, %c0_i32_19 : i32
    scf.if %31 {
      %c0_20 = arith.constant 0 : index
      %c0_21 = arith.constant 0 : index
      %32 = vector.load %arg7[%c0_20, %c0_21] : memref<16x1xi32, #tpu.memory_space<vmem>>, vector<16x1xi32>
      %c0_22 = arith.constant 0 : index
      %c0_23 = arith.constant 0 : index
      %33 = vector.load %arg5[%c0_22, %c0_23] : memref<16x1xi32, #tpu.memory_space<vmem>>, vector<16x1xi32>
      tpu.vector_store %arg5[%c0_22, %c0_23], %32 {strides = array<i32>} : memref<16x1xi32, #tpu.memory_space<vmem>>, vector<16x1xi32>,
    } else {
    }
    return
  }
  func.func @transform_0(%arg0: i32, %arg1: i32) -> (i32, i32) {
    %c0_i32 = arith.constant 0 : i32
    %c0_i32_0 = arith.constant 0 : i32
    return %arg0, %c0_i32 : i32, i32
  }
  func.func @transform_1(%arg0: i32, %arg1: i32) -> (i32, i32) {
    %c0_i32 = arith.constant 0 : i32
    %c0_i32_0 = arith.constant 0 : i32
    return %arg1, %c0_i32 : i32, i32
  }
  func.func @transform_2(%arg0: i32, %arg1: i32) -> (i32, i32) {
    %c0_i32 = arith.constant 0 : i32
    %c0_i32_0 = arith.constant 0 : i32
    return %c0_i32, %arg1 : i32, i32
  }
  func.func @transform_3(%arg0: i32, %arg1: i32) -> (i32, i32) {
    %c0_i32 = arith.constant 0 : i32
    %c0_i32_0 = arith.constant 0 : i32
    return %arg0, %c0_i32 : i32, i32
  }
}

</mosaic_0001>

<bundles_post_ra>
// kernel: tpu_custom_call.1
= control target key start
LH: loop header
LB: loop body
LE: loop exit
PB: predicated region body
PF: predicated region fallthrough
CT: control target
= control target key end

     0   :  { %8 = vsyncpa [#allocation5], 0  ;;  %s400_s0 = inlined_call_operand.hbm [shape: bf16[16,128], index: 0, kind: input, shape index: {}]   ;;  %s401_s1 = inlined_call_operand.hbm [shape: bf16[128,128], index: 1, kind: input, shape index: {}]   ;;  %s402_s2 = inlined_call_operand.vmem [shape: f32[1,128], index: 2, kind: input, shape index: {}]   ;;  %s403_s3 = inlined_call_operand.vmem [shape: s32[16,1], index: 3, kind: output, shape index: {}]  }
   0x1   :  { %9 = vsyncpa [#allocation7], 0  ;;  %s343_s12 = smov [#allocation4]  }
   0x2   :  { %s15_s13 = sshll.u32 %s343_s12, 4  ;;  %s16_s13 = int_to_ptr.vmem [resolvable:$true] %s15_s13 }
   0x3   :  { %s307_s14 = scalar_lea.vmem %s16_s13, 128  ;;  %p312_p1 = scmp.lt.s32.totalorder %s16_s13, %s16_s13 }
   0x4   :  { %p308_p0 = scmp.ne.s32.totalorder %s16_s13, %s307_s14  ;;  %p313_p2 = scmp.lt.s32.totalorder %s307_s14, %s307_s14 }
   0x6   :  { %p314_p3 = por %p313_p2, %p312_p1 }
   0x8   :  { %p315_p4 = pnand %p314_p3, %p308_p0 }
   0xa   :  { %318 = shalt.err (!%p315_p4)
}
   0xb   :  { %s344_s15 = smov 64   ;;  %s345_s16 = smov 4  }
   0xc   :  { %21 = dma.hbm_to_vmem [thread:$0]  %s400_s0, 128, %s16_s13, [#allocation5], %s344_s15, %s344_s15, %s345_s16  }
   0xd   :  { %s346_s19 = smov [#allocation6]  }
   0xe   :  { %s27_s20 = sshll.u32 %s346_s19, 4  ;;  %s28_s20 = int_to_ptr.vmem [resolvable:$true] %s27_s20 }
   0xf   :  { %s327_s21 = scalar_lea.vmem %s28_s20, 1024  ;;  %p332_p6 = scmp.lt.s32.totalorder %s28_s20, %s28_s20 }
  0x10   :  { %p328_p5 = scmp.ne.s32.totalorder %s28_s20, %s327_s21  ;;  %p333_p7 = scmp.lt.s32.totalorder %s327_s21, %s327_s21 }
  0x12   :  { %p334_p8 = por %p333_p7, %p332_p6 }
  0x14   :  { %p335_p9 = pnand %p334_p8, %p328_p5 }
  0x16   :  { %338 = shalt.err (!%p335_p9)
}
  0x17   :  { %33 = dma.hbm_to_vmem [thread:$0]  %s401_s1, 1024, %s28_s20, [#allocation7], %s344_s15, %s344_s15, %s345_s16  }
  0x18   :  { %339 = dma.done.wait [#allocation5], 128  }
  0x19   :  { %340 = vsyncadd [#allocation5], 4294967168 }
  0x1a   :  { %341 = dma.done.wait [#allocation7], 1024  }
  0x1b   :  { %342 = vsyncadd [#allocation7], 4294966272  ;;  %v347_v0 = vmov 0.0   ;;  %vm348_vm0 = vmmov 0   ;;  %v290_v1 = vld [vmem:[#allocation6 + $0x38] sm:$0xff]   ;;  %v291_v2 = vld [vmem:[#allocation6 + $0x30] sm:$0xff]   ;;  %v174_v18 = vlaneseq }
  0x1c   :  { %262 = vmatprep.subr.bf16.mxu0 %v347_v0  ;;  %278 = vmatprep.mubr.msk.bf16.mxu0 %vm348_vm0, %v347_v0  ;;  %v292_v3 = vld [vmem:[#allocation6 + $0x28] sm:$0xff]   ;;  %v293_v4 = vld [vmem:[#allocation6 + $0x20] sm:$0xff]   ;;  %v294_v5 = vld [vmem:[#allocation6 + $0x18] sm:$0xff]   ;;  %vm47_vm1 = vcmask 7168   ;;  %v349_v10 = vmov inf   ;;  %v350_v32 = vmov 0  }
  0x1d   :  { %263 = vmatpush3.bf16.xpose.msra.mxu0 %v290_v1  ;;  %v295_v6 = vld [vmem:[#allocation6 + $0x10] sm:$0xff]   ;;  %v296_v7 = vld [vmem:[#allocation6 + $0x8] sm:$0xff]   ;;  %v297_v8 = vld [vmem:[#allocation6] sm:$0xff]   ;;  %48 = vst.msk [vmem:[#allocation2] sm:$0xff] %vm47_vm1, %v349_v10  ;;  %v175_v20 = vand.u32 127, %v174_v18 }
  0x1e   :  { %264 = vmatprep.subr.bf16.mxu0 %v347_v0  ;;  %v298_v9 = vld [vmem:[#allocation4] sm:$0xff]   ;;  %49 = vst.msk [vmem:[#allocation2 + $0x8] sm:$0xff] %vm47_vm1, %v349_v10  ;;  %50 = vst.msk [vmem:[#allocation3] sm:$0xff] %vm47_vm1, %v350_v32 }
  0x1f   :  { %v252_v11 = vld [vmem:[%s402_s2] ss:$0 sm:$0xff]  ;;  %51 = vst.msk [vmem:[#allocation3 + $0x8] sm:$0xff] %vm47_vm1, %v350_v32 }
  0x24   :  { %v215_v19 = vld [vmem:[#allocation2] sm:$0xff] }
  0x25   :  { %265 = vmatpush3.bf16.xpose.msra.mxu0 %v291_v2  ;;  %v216_v23 = vld [vmem:[#allocation2 + $0x8] sm:$0xff]  ;;  %v224_v46 = vld [vmem:[#allocation3] sm:$0xff] }
  0x26   :  { %266 = vmatprep.subr.bf16.mxu0 %v347_v0  ;;  %v225_v52 = vld [vmem:[#allocation3 + $0x8] sm:$0xff] }
  0x2d   :  { %267 = vmatpush3.bf16.xpose.msra.mxu0 %v292_v3 }
  0x2e   :  { %268 = vmatprep.subr.bf16.mxu0 %v347_v0 }
  0x35   :  { %269 = vmatpush3.bf16.xpose.msra.mxu0 %v293_v4 }
  0x36   :  { %270 = vmatprep.subr.bf16.mxu0 %v347_v0 }
  0x3d   :  { %271 = vmatpush3.bf16.xpose.msra.mxu0 %v294_v5 }
  0x3e   :  { %272 = vmatprep.subr.bf16.mxu0 %v347_v0 }
  0x45   :  { %273 = vmatpush3.bf16.xpose.msra.mxu0 %v295_v6 }
  0x46   :  { %274 = vmatprep.subr.bf16.mxu0 %v347_v0 }
  0x4d   :  { %275 = vmatpush3.bf16.xpose.msra.mxu0 %v296_v7 }
  0x4e   :  { %276 = vmatprep.subr.bf16.mxu0 %v347_v0 }
  0x55   :  { %277 = vmatpush3.bf16.xpose.msra.mxu0 %v297_v8 }
  0x5c   :  { %279 = vmatmul.mubr.bf16.vlgmr.msra.gmra.mxu0 %v298_v9 }
 0x11c   :  { %v158_v12 = vpop.f32.mrf.mxu0 }
 0x11d   :  { %v172_v13 = vsub.f32 %v252_v11, %v158_v12 }
 0x11e   :  { %v280_v14 = vpop.f32.mrf.mxu0 }
 0x11f   :  { %179 = vmin.xlane.f32.xlu0 %v172_v13 }
 0x120   :  { %v161_v15 = vpop.f32.mrf.mxu0 }
 0x121   :  { %v173_v16 = vsub.f32 %v252_v11, %v161_v15 }
 0x122   :  { %v281_v17 = vpop.f32.mrf.mxu0 }
 0x123   :  { %181 = vmin.xlane.f32.xlu0 %v173_v16 }
 0x1a8   :  { %v180_v21 = vpop.xlane.xlu0 %179 }
 0x1a9   :  { %vm183_vm2 = vcmp.eq.f32.partialorder %v172_v13, %v180_v21  ;;  %vm217_vm3 = vcmp.lt.f32.partialorder %v180_v21, %v215_v19 }
 0x1aa   :  { %v219_v22 = vsel %vm217_vm3, %v180_v21, %v215_v19  ;;  %v185_v24 = vsel %vm183_vm2, %v175_v20, 1073741824 }
 0x1ab   :  { %222 = vst.msk [vmem:[#allocation2] sm:$0xff] %vm47_vm1, %v219_v22  ;;  %v188_v25 = vshra.s32 %v185_v24, 16  ;;  %v187_v33 = vand.u32 65535, %v185_v24 }
 0x1ac   :  { %v182_v26 = vpop.xlane.xlu0 %181 }
 0x1ad   :  { %vm184_vm4 = vcmp.eq.f32.partialorder %v173_v16, %v182_v26  ;;  %vm218_vm5 = vcmp.lt.f32.partialorder %v182_v26, %v216_v23  ;;  %v190_v27 = vcvt.s32.f32 %v188_v25  ;;  %v189_v35 = vcvt.s32.f32 %v187_v33 }
 0x1ae   :  { %v220_v28 = vsel %vm218_vm5, %v182_v26, %v216_v23  ;;  %v186_v29 = vsel %vm184_vm4, %v175_v20, 1073741824 }
 0x1af   :  { %223 = vst.msk [vmem:[#allocation2 + $0x8] sm:$0xff] %vm47_vm1, %v220_v28  ;;  %191 = vmin.xlane.f32.xlu1 %v190_v27  ;;  %v202_v30 = vshra.s32 %v186_v29, 16  ;;  %v201_v36 = vand.u32 65535, %v186_v29 }
 0x1b1   :  { %v204_v31 = vcvt.s32.f32 %v202_v30  ;;  %v203_v39 = vcvt.s32.f32 %v201_v36 }
 0x1b3   :  { %205 = vmin.xlane.f32.xlu1 %v204_v31 }
 0x238   :  { %v192_v34 = vpop.xlane.xlu1 %191 }
 0x239   :  { %vm193_vm6 = vcmp.eq.f32.partialorder %v190_v27, %v192_v34  ;;  %v198_v41 = vcvt.f32.s32 %v192_v34 }
 0x23a   :  { %v194_v37 = vsel %vm193_vm6, %v189_v35, inf }
 0x23b   :  { %195 = vmin.xlane.f32.xlu0 %v194_v37  ;;  %v199_v43 = vshll.u32 %v198_v41, 16 }
 0x23c   :  { %v206_v38 = vpop.xlane.xlu1 %205 }
 0x23d   :  { %vm207_vm7 = vcmp.eq.f32.partialorder %v204_v31, %v206_v38  ;;  %v212_v44 = vcvt.f32.s32 %v206_v38 }
 0x23e   :  { %v208_v40 = vsel %vm207_vm7, %v203_v39, inf }
 0x23f   :  { %209 = vmin.xlane.f32.xlu1 %v208_v40  ;;  %v213_v49 = vshll.u32 %v212_v44, 16 }
 0x2c4   :  { %v196_v42 = vpop.xlane.xlu0 %195 }
 0x2c5   :  { %v197_v45 = vcvt.f32.s32 %v196_v42 }
 0x2c7   :  { %v200_v47 = vadd.s32 %v199_v43, %v197_v45 }
 0x2c8   :  { %v210_v48 = vpop.xlane.xlu1 %209 }
 0x2c9   :  { %v226_v50 = vsel %vm217_vm3, %v200_v47, %v224_v46  ;;  %v211_v51 = vcvt.f32.s32 %v210_v48 }
 0x2ca   :  { %228 = vst.msk [vmem:[#allocation3] sm:$0xff] %vm47_vm1, %v226_v50 }
 0x2cb   :  { %v214_v53 = vadd.s32 %v213_v49, %v211_v51 }
 0x2cd   :  { %v227_v54 = vsel %vm218_vm5, %v214_v53, %v225_v52 }
 0x2ce   :  { %229 = vst.msk [vmem:[#allocation3 + $0x8] sm:$0xff] %vm47_vm1, %v227_v54 }
 0x2d1   :  { %v233_v55 = vld [vmem:[#allocation3] sm:$0xff] }
 0x2d2   :  { %235 = vst.msk [vmem:[%s403_s3] sm:$0xff] %vm47_vm1, %v233_v55 }
 0x2d5   :  { %v234_v56 = vld [vmem:[#allocation3 + $0x8] sm:$0xff] }
 0x2d6   :  { %236 = vst.msk [vmem:[%s403_s3 + $0x8] sm:$0xff] %vm47_vm1, %v234_v56 }
 0x2d7   :  { %241 = vsyncpa [#allocation5], 1 }
 0x2d8   :  { %242 = vsyncpa [#allocation7], 1 }

</bundles_post_ra>
